<compile_context>
chip_gen: v6e
topology: v6e:2x2x1
jax: 0.10.0
libtpu: 0.0.40
codegen_flags: <defaults>
</compile_context>

<pallas_src>
import jax
import jax.numpy as jnp
from jax.experimental import pallas as pl
from jax.experimental.pallas import tpu as pltpu


def ca_kernel(x_ref, w1t_ref, w2t_ref, o_ref):
    """ChannelAttention2D over one batch slab. x_ref: (TN, C, H*W), lane-dense last dim."""
    tn, _, hw = x_ref.shape

    # Global avg / max pooling as a single last-axis reduction, straight from the ref.
    # No full-tile f32 copy is materialized (max is exact in bf16; sum accumulates in f32).
    avg = jnp.sum(x_ref[...], axis=-1, dtype=jnp.float32) * (1.0 / hw)   # (TN, C)
    mxx = jnp.max(x_ref[...], axis=-1).astype(jnp.float32)               # (TN, C)

    # Fused channel MLP over both pooled sets: one pair of matmuls instead of two.
    pooled = jnp.concatenate([avg, mxx], axis=0)                         # (2*TN, C)
    w1t = w1t_ref[...].astype(jnp.float32)                               # (C, hidden) = fc1.weight.T
    w2t = w2t_ref[...].astype(jnp.float32)                               # (hidden, C) = fc2.weight.T
    h = jnp.maximum(
        jnp.dot(pooled, w1t, preferred_element_type=jnp.float32), 0.0)   # (2*TN, hidden)
    out = jnp.dot(h, w2t, preferred_element_type=jnp.float32)            # (2*TN, C)

    att = jax.nn.sigmoid(out[:tn] + out[tn:])                            # (TN, C) avg + max path

    # Re-read the tile here (VMEM loads are cheap, data is resident in the pipeline buffer)
    # so the (TN, C, HW) value is not kept live across the reductions / concat / matmuls.
    x = x_ref[...]
    o_ref[...] = (x * att[:, :, None].astype(x.dtype)).astype(o_ref.dtype)


_DEFAULT_VMEM_BYTES = 128 << 20


def _tpu_info():
    """Return (physical VMEM bytes per core, is_multi_tc_chip) with safe fallbacks."""
    vmem = _DEFAULT_VMEM_BYTES
    try:
        vmem = int(pltpu.get_tpu_info().vmem_capacity_bytes)
    except Exception:
        pass
    multi_tc = False
    try:
        multi_tc = "v7" in jax.devices()[0].device_kind.lower()
    except Exception:
        pass
    # v7x is also the only generation with 64 MiB VMEM per TensorCore.
    multi_tc = multi_tc or vmem <= (64 << 20)
    return vmem, multi_tc


def _pick_tn(n, bytes_per_item, *, target_bytes=4 << 20, vmem_cap=None, multi_tc=False):
    """Batch-block size: ~4 MiB input tiles, divides N, fits the VMEM budget when
    double-buffered (in+out), and (v7x only) keeps >= 2 grid steps for both TensorCores."""
    tn = max(1, target_bytes // max(1, bytes_per_item))
    tn = min(tn, n)
    while n % tn:
        tn -= 1
    if vmem_cap is not None:
        # Double-buffered input + output tiles (+ weights/headroom) must fit the budget.
        while tn > 1 and 4 * tn * bytes_per_item + (2 << 20) > vmem_cap:
            tn -= 1
            while n % tn:
                tn -= 1
    if multi_tc and n // tn < 2 and n >= 2:
        tn = max(1, n // 2)
        while n % tn:
            tn -= 1
    return tn


def channel_attention_2d(x, w1, w2, *, tn=None):
    """x: (N, C, H, W); w1: (hidden, C) fc1 1x1-conv weight; w2: (C, hidden) fc2 weight."""
    n, c, h, w = x.shape
    hw = h * w
    hidden = w1.shape[0]

    vmem_phys, multi_tc = _tpu_info()
    # Leave headroom under physical per-core VMEM (~48 MiB on v7x, ~96 MiB on v5e/v6e).
    vmem_cap = (vmem_phys // 4) * 3

    item_bytes = c * hw * x.dtype.itemsize
    if tn is None:
        tn = _pick_tn(n, item_bytes, vmem_cap=vmem_cap, multi_tc=multi_tc)
    assert n % tn == 0, (n, tn)

    x_flat = x.reshape(n, c, hw)        # free for contiguous NCHW
    w1t = jnp.transpose(w1)             # (C, hidden)
    w2t = jnp.transpose(w2)             # (hidden, C)

    # Explicit VMEM budget: double-buffered (input + output) tiles + weights + headroom,
    # clamped to the generation-aware cap (no hard 32 MiB ceiling).
    tile_bytes = tn * item_bytes
    vmem_limit = int(min(max(4 * tile_bytes + (2 << 20), 8 << 20), vmem_cap))
    # TODO(synk): for per-item footprints that cannot double-buffer even at tn=1
    # (>~15 MiB/item on v7x's 64 MiB VMEM), switch the x/out BlockSpecs to
    # pipeline_mode=pl.Buffered(1) or a two-pass (pool, then scale) grid over H*W.
    # TODO(synk): if H*W % 128 != 0 but C % 128 == 0 (e.g. 7x7/14x14 maps), use a
    # channels-last (TN, H*W, C) block instead so stores stay unmasked / lane-dense.

    out_flat = pl.pallas_call(
        ca_kernel,
        out_shape=jax.ShapeDtypeStruct((n, c, hw), x.dtype),
        grid=(n // tn,),
        in_specs=[
            pl.BlockSpec((tn, c, hw), lambda i: (i, 0, 0)),   # batch-blocked x slab
            pl.BlockSpec((c, hidden), lambda i: (0, 0)),      # fc1 weight (pre-transposed)
            pl.BlockSpec((hidden, c), lambda i: (0, 0)),      # fc2 weight (pre-transposed)
        ],
        out_specs=pl.BlockSpec((tn, c, hw), lambda i: (i, 0, 0)),
        compiler_params=pltpu.CompilerParams(
            dimension_semantics=("parallel",),
            vmem_limit_bytes=vmem_limit,
        ),
    )(x_flat, w1t, w2t)
    return out_flat.reshape(n, c, h, w)


def reference(x, w1, w2):
    # Pure-JAX mirror of the PyTorch ChannelAttention2D forward (NCHW).
    avg = jnp.mean(x, axis=(2, 3))      # (N, C)  AdaptiveAvgPool2d(1)
    mxx = jnp.max(x, axis=(2, 3))       # (N, C)  AdaptiveMaxPool2d(1)

    def mlp(v):
        return jnp.maximum(v @ w1.T, 0.0) @ w2.T

    att = jax.nn.sigmoid(mlp(avg) + mlp(mxx))     # (N, C)
    return x * att[:, :, None, None]


if __name__ == "__main__":
    key = jax.random.PRNGKey(0)
    kx, k1, k2 = jax.random.split(key, 3)

    N, C, H, W = 4, 32, 16, 16
    ratio = 16
    hidden = C // ratio                 # 2

    x = jax.random.normal(kx, (N, C, H, W), jnp.float32)
    # Shapes match the nn.Conv2d(1x1, bias=False) parameters (out, in).
    w1 = jax.random.normal(k1, (hidden, C), jnp.float32) * 0.1   # fc1.weight[:, :, 0, 0]
    w2 = jax.random.normal(k2, (C, hidden), jnp.float32) * 0.1   # fc2.weight[:, :, 0, 0]

    out = channel_attention_2d(x, w1, w2)
    out = jax.block_until_ready(out)

    ref = reference(x, w1, w2)
    err = float(jnp.max(jnp.abs(out - ref)))
    assert jnp.allclose(out, ref, atol=1e-5, rtol=1e-5), f"max abs err = {err}"
    print("KERNEL_OK")
</pallas_src>

<mosaic_0001>
module attributes {stable_mosaic.version = 11 : i64} {
  func.func @ca_kernel(%arg0: i32, %arg1: memref<4x32x256xf32, #tpu.memory_space<vmem>>, %arg2: memref<32x2xf32, #tpu.memory_space<vmem>>, %arg3: memref<2x32xf32, #tpu.memory_space<vmem>>, %arg4: memref<4x32x256xf32, #tpu.memory_space<vmem>>) attributes {dimension_semantics = [#tpu.dimension_semantics<parallel>], iteration_bounds = array<i64: 1>, scalar_prefetch = 0 : i64, scratch_operands = 0 : i64, tpu.core_type = #tpu.core_type<tc>, window_params = [{transform_indices = @transform_0, window_bounds = array<i64: 4, 32, 256>}, {pipeline_mode = #tpu.pipeline_mode<synchronous>, transform_indices = @transform_1, window_bounds = array<i64: 32, 2>}, {pipeline_mode = #tpu.pipeline_mode<synchronous>, transform_indices = @transform_2, window_bounds = array<i64: 2, 32>}, {transform_indices = @transform_3, window_bounds = array<i64: 4, 32, 256>}]} {
    %c0 = arith.constant 0 : index
    %c0_0 = arith.constant 0 : index
    %c0_1 = arith.constant 0 : index
    %0 = vector.load %arg1[%c0, %c0_0, %c0_1] : memref<4x32x256xf32, #tpu.memory_space<vmem>>, vector<4x32x256xf32>
    %cst = arith.constant dense<0.000000e+00> : vector<4x32xf32>
    %1 = vector.multi_reduction <add>, %0, %cst [2] : vector<4x32x256xf32> to vector<4x32xf32>
    %cst_2 = arith.constant 3.906250e-03 : f32
    %2 = vector.broadcast %cst_2 : f32 to vector<4x32xf32>
    %3 = arith.mulf %1, %2 : vector<4x32xf32>
    %c0_3 = arith.constant 0 : index
    %c0_4 = arith.constant 0 : index
    %c0_5 = arith.constant 0 : index
    %4 = vector.load %arg1[%c0_3, %c0_4, %c0_5] : memref<4x32x256xf32, #tpu.memory_space<vmem>>, vector<4x32x256xf32>
    %cst_6 = arith.constant dense<0xFF800000> : vector<4x32xf32>
    %5 = vector.multi_reduction <maximumf>, %4, %cst_6 [2] : vector<4x32x256xf32> to vector<4x32xf32>
    %6 = tpu.concatenate %3, %5 in 0 : vector<4x32xf32>, vector<4x32xf32> -> vector<8x32xf32>
    %c0_7 = arith.constant 0 : index
    %c0_8 = arith.constant 0 : index
    %7 = vector.load %arg2[%c0_7, %c0_8] : memref<32x2xf32, #tpu.memory_space<vmem>>, vector<32x2xf32>
    %c0_9 = arith.constant 0 : index
    %c0_10 = arith.constant 0 : index
    %8 = vector.load %arg3[%c0_9, %c0_10] : memref<2x32xf32, #tpu.memory_space<vmem>>, vector<2x32xf32>
    %cst_11 = arith.constant dense<0.000000e+00> : vector<8x2xf32>
    %9 = tpu.matmul %6, %7, %cst_11 {dimension_numbers = #tpu.dot_dimension_numbers<[1], [0], [0], [1], [0, 0, 1, 1], [], []>} : vector<8x32xf32>, vector<32x2xf32>, vector<8x2xf32> -> vector<8x2xf32>
    %cst_12 = arith.constant 0.000000e+00 : f32
    %10 = vector.broadcast %cst_12 : f32 to vector<8x2xf32>
    %11 = arith.maximumf %9, %10 : vector<8x2xf32>
    %cst_13 = arith.constant dense<0.000000e+00> : vector<8x32xf32>
    %12 = tpu.matmul %11, %8, %cst_13 {dimension_numbers = #tpu.dot_dimension_numbers<[1], [0], [0], [1], [0, 0, 1, 1], [], []>} : vector<8x2xf32>, vector<2x32xf32>, vector<8x32xf32> -> vector<8x32xf32>
    %13 = vector.extract_strided_slice %12 {offsets = [0, 0], sizes = [4, 32], strides = [1, 1]} : vector<8x32xf32> to vector<4x32xf32>
    %14 = vector.extract_strided_slice %12 {offsets = [4, 0], sizes = [4, 32], strides = [1, 1]} : vector<8x32xf32> to vector<4x32xf32>
    %15 = arith.addf %13, %14 : vector<4x32xf32>
    %16 = arith.negf %15 : vector<4x32xf32>
    %17 = math.exp %16 : vector<4x32xf32>
    %cst_14 = arith.constant 1.000000e+00 : f32
    %18 = vector.broadcast %cst_14 : f32 to vector<4x32xf32>
    %19 = arith.addf %18, %17 : vector<4x32xf32>
    %20 = arith.divf %18, %19 : vector<4x32xf32>
    %c0_15 = arith.constant 0 : index
    %c0_16 = arith.constant 0 : index
    %c0_17 = arith.constant 0 : index
    %21 = vector.load %arg1[%c0_15, %c0_16, %c0_17] : memref<4x32x256xf32, #tpu.memory_space<vmem>>, vector<4x32x256xf32>
    %22 = vector.shape_cast %20 : vector<4x32xf32> to vector<4x32x1xf32>
    %23 = vector.broadcast %22 : vector<4x32x1xf32> to vector<4x32x256xf32>
    %24 = arith.mulf %21, %23 : vector<4x32x256xf32>
    %c0_18 = arith.constant 0 : index
    %c0_19 = arith.constant 0 : index
    %c0_20 = arith.constant 0 : index
    %25 = vector.load %arg4[%c0_18, %c0_19, %c0_20] : memref<4x32x256xf32, #tpu.memory_space<vmem>>, vector<4x32x256xf32>
    tpu.vector_store %arg4[%c0_18, %c0_19, %c0_20], %24 {strides = array<i32>} : memref<4x32x256xf32, #tpu.memory_space<vmem>>, vector<4x32x256xf32>,
    return
  }
  func.func @transform_0(%arg0: i32) -> (i32, i32, i32) {
    %c0_i32 = arith.constant 0 : i32
    %c0_i32_0 = arith.constant 0 : i32
    %c0_i32_1 = arith.constant 0 : i32
    return %arg0, %c0_i32, %c0_i32_0 : i32, i32, i32
  }
  func.func @transform_1(%arg0: i32) -> (i32, i32) {
    %c0_i32 = arith.constant 0 : i32
    %c0_i32_0 = arith.constant 0 : i32
    %c0_i32_1 = arith.constant 0 : i32
    return %c0_i32, %c0_i32_0 : i32, i32
  }
  func.func @transform_2(%arg0: i32) -> (i32, i32) {
    %c0_i32 = arith.constant 0 : i32
    %c0_i32_0 = arith.constant 0 : i32
    %c0_i32_1 = arith.constant 0 : i32
    return %c0_i32, %c0_i32_0 : i32, i32
  }
  func.func @transform_3(%arg0: i32) -> (i32, i32, i32) {
    %c0_i32 = arith.constant 0 : i32
    %c0_i32_0 = arith.constant 0 : i32
    %c0_i32_1 = arith.constant 0 : i32
    return %arg0, %c0_i32, %c0_i32_0 : i32, i32, i32
  }
}

</mosaic_0001>

<bundles_post_ra>
// kernel: tpu_custom_call.1
= control target key start
LH: loop header
LB: loop body
LE: loop exit
PB: predicated region body
PF: predicated region fallthrough
CT: control target
= control target key end

     0   :  { %8 = vsyncpa [#allocation3], 0  ;;  %s1102_s0 = inlined_call_operand.hbm [shape: f32[4,32,256], index: 0, kind: input, shape index: {}]   ;;  %s1103_s1 = inlined_call_operand.vmem [shape: f32[32,2], index: 1, kind: input, shape index: {}]   ;;  %s1104_s2 = inlined_call_operand.vmem [shape: f32[2,32], index: 2, kind: input, shape index: {}]   ;;  %s1105_s3 = inlined_call_operand.hbm [shape: f32[4,32,256], index: 3, kind: output, shape index: {}]  }
   0x1   :  { %9 = vsyncpa [#allocation4], 0  ;;  %s787_s12 = smov [#allocation2]  }
   0x2   :  { %s15_s13 = sshll.u32 %s787_s12, 4  ;;  %s16_s13 = int_to_ptr.vmem [resolvable:$true] %s15_s13 }
   0x3   :  { %s751_s14 = scalar_lea.vmem %s16_s13, 4096  ;;  %p756_p1 = scmp.lt.s32.totalorder %s16_s13, %s16_s13 }
   0x4   :  { %p752_p0 = scmp.ne.s32.totalorder %s16_s13, %s751_s14  ;;  %p757_p2 = scmp.lt.s32.totalorder %s751_s14, %s751_s14 }
   0x6   :  { %p758_p3 = por %p757_p2, %p756_p1 }
   0x8   :  { %p759_p4 = pnand %p758_p3, %p752_p0 }
   0xa   :  { %762 = shalt.err (!%p759_p4)
}
   0xb   :  { %s788_s15 = smov 256   ;;  %s789_s16 = smov 16  }
   0xc   :  { %21 = dma.hbm_to_vmem [thread:$0]  %s1102_s0, 4096, %s16_s13, [#allocation3], %s788_s15, %s788_s15, %s789_s16  }
   0xd   :  { %783 = dma.done.wait [#allocation3], 4096  }
   0xe   :  { %784 = vsyncadd [#allocation3], 4294963200  ;;  %v819_v0 = vld [vmem:[#allocation2 + $0x40] sm:$0xff]  ;;  %v821_v1 = vld [vmem:[#allocation2 + $0x48] sm:$0xff]  ;;  %vm791_vm0 = vmmov 0   ;;  %vm200_vm1 = vcmask 130112  }
   0xf   :  { %v823_v2 = vld [vmem:[#allocation2] sm:$0xff]  ;;  %v73_v3 = vadd.f32 %v821_v1, %v819_v0  ;;  %v827_v4 = vld [vmem:[#allocation2 + $0x8] sm:$0xff]  ;;  %v829_v5 = vld [vmem:[#allocation2 + $0x50] sm:$0xff]  ;;  %v137_v40 = vmax.f32 %v819_v0, %v821_v1  ;;  %vm207_vm2 = vcmask 195712   ;;  %vm214_vm3 = vcmask 261312  }
  0x10   :  { %v831_v6 = vld [vmem:[#allocation2 + $0x58] sm:$0xff]  ;;  %v61_v7 = vadd.f32 %v827_v4, %v823_v2  ;;  %v835_v8 = vld [vmem:[#allocation2 + $0x10] sm:$0xff]  ;;  %v843_v12 = vld [vmem:[#allocation2 + $0x60] sm:$0xff]  ;;  %v125_v38 = vmax.f32 %v823_v2, %v827_v4  ;;  %vm273_vm4 = vcmask 1041409   ;;  %vm372_vm5 = vcmask 1045509  }
  0x11   :  { %v837_v9 = vld [vmem:[#allocation2 + $0x18] sm:$0xff]  ;;  %74 = vadd.xlane.f32.xlu1 %v73_v3  ;;  %v76_v10 = vadd.f32 %v831_v6, %v829_v5  ;;  %v845_v13 = vld [vmem:[#allocation2 + $0x68] sm:$0xff]  ;;  %v847_v14 = vld [vmem:[#allocation2 + $0x20] sm:$0xff]  ;;  %v140_v45 = vmax.f32 %v829_v5, %v831_v6  ;;  %v790_v3 = vmov 0.0   ;;  %vm374_vm6 = vcmask 1046534  }
  0x12   :  { %62 = vadd.xlane.f32.xlu0 %v61_v7  ;;  %v64_v11 = vadd.f32 %v837_v9, %v835_v8  ;;  %v849_v15 = vld [vmem:[#allocation2 + $0x28] sm:$0xff]  ;;  %v79_v16 = vadd.f32 %v845_v13, %v843_v12  ;;  %v855_v18 = vld [vmem:[#allocation2 + $0x90] sm:$0xff]  ;;  %v857_v19 = vld [vmem:[#allocation2 + $0x98] sm:$0xff]  ;;  %v128_v41 = vmax.f32 %v835_v8, %v837_v9  ;;  %v143_v51 = vmax.f32 %v843_v12, %v845_v13 }
  0x13   :  { %v67_v17 = vadd.f32 %v849_v15, %v847_v14  ;;  %v859_v20 = vld [vmem:[#allocation2 + $0x80] sm:$0xff]  ;;  %v861_v21 = vld [vmem:[#allocation2 + $0x88] sm:$0xff]  ;;  %v88_v22 = vadd.f32 %v857_v19, %v855_v18  ;;  %v867_v24 = vld [vmem:[#allocation2 + $0x70] sm:$0xff]  ;;  %v131_v48 = vmax.f32 %v847_v14, %v849_v15  ;;  %v152_v55 = vmax.f32 %v855_v18, %v857_v19  ;;  %717 = vmatprep.subr.mxu0 %v790_v3 }
  0x14   :  { %v85_v23 = vadd.f32 %v861_v21, %v859_v20  ;;  %v869_v25 = vld [vmem:[#allocation2 + $0x78] sm:$0xff]  ;;  %v871_v26 = vld [vmem:[#allocation2 + $0x30] sm:$0xff]  ;;  %v879_v30 = vld [vmem:[#allocation2 + $0xc0] sm:$0xff]  ;;  %v149_v50 = vmax.f32 %v859_v20, %v861_v21  ;;  %728 = vmatprep.subr.mxu1 %v790_v3  ;;  %725 = vmatprep.mubr.msk.f32.mxu0 %vm791_vm0, %v790_v3  ;;  %vm275_vm7 = vcmask 1042434   ;;  %vm277_vm8 = vcmask 1043459  }
  0x15   :  { %77 = vadd.xlane.f32.xlu1 %v76_v10  ;;  %v873_v27 = vld [vmem:[#allocation2 + $0x38] sm:$0xff]  ;;  %v82_v28 = vadd.f32 %v869_v25, %v867_v24  ;;  %1116 = vst [vmem:[#allocation8_spill] sm:$0xff] %v879_v30  ;;  %v881_v31 = vld [vmem:[#allocation2 + $0xc8] sm:$0xff]  ;;  %v883_v32 = vld [vmem:[#allocation2 + $0xa0] sm:$0xff]  ;;  %v146_v56 = vmax.f32 %v867_v24, %v869_v25  ;;  %730 = vmatprep.mubr.msk.f32.mxu1 %vm791_vm0, %v790_v3  ;;  %vm376_vm9 = vcmask 1047559   ;;  %vm379_vm10 = vcmask 1043456  }
  0x16   :  { %65 = vadd.xlane.f32.xlu0 %v64_v11  ;;  %v70_v29 = vadd.f32 %v873_v27, %v871_v26  ;;  %1117 = vst [vmem:[#allocation9_spill] sm:$0xff] %v881_v31  ;;  %v885_v33 = vld [vmem:[#allocation2 + $0xa8] sm:$0xff]  ;;  %v97_v34 = vadd.f32 %v881_v31, %v879_v30  ;;  %v891_v36 = vld [vmem:[#allocation2 + $0xd0] sm:$0xff]  ;;  %v893_v37 = vld [vmem:[#allocation2 + $0xd8] sm:$0xff]  ;;  %v134_v57 = vmax.f32 %v871_v26, %v873_v27  ;;  %vm386_vm11 = vcmask 261120  }
  0x17   :  { %v91_v35 = vadd.f32 %v885_v33, %v883_v32  ;;  %1118 = vst [vmem:[#allocation10_spill] sm:$0xff] %v891_v36  ;;  %1119 = vst [vmem:[#allocation11_spill] sm:$0xff] %v893_v37  ;;  %v100_v39 = vadd.f32 %v893_v37, %v891_v36  ;;  %v903_v42 = vld [vmem:[#allocation2 + $0xb0] sm:$0xff]  ;;  %v905_v43 = vld [vmem:[#allocation2 + $0xb8] sm:$0xff]  ;;  %v161_v58 = vmax.f32 %v879_v30, %v881_v31  ;;  %vm465_vm12 = vcmask 1041408  }
  0x18   :  { %1120 = vst [vmem:[#allocation12_spill] sm:$0xff] %v903_v42  ;;  %1121 = vst [vmem:[#allocation13_spill] sm:$0xff] %v905_v43  ;;  %v94_v44 = vadd.f32 %v905_v43, %v903_v42  ;;  %v911_v46 = vld [vmem:[#allocation2 + $0xe0] sm:$0xff]  ;;  %v913_v47 = vld [vmem:[#allocation2 + $0xe8] sm:$0xff]  ;;  %v155_v59 = vmax.f32 %v883_v32, %v885_v33  ;;  %v158_v60 = vmax.f32 %v903_v42, %v905_v43  ;;  %vm461_vm13 = vcmask 15360  }
  0x19   :  { %80 = vadd.xlane.f32.xlu1 %v79_v16  ;;  %1122 = vst [vmem:[#allocation14_spill] sm:$0xff] %v911_v46  ;;  %1123 = vst [vmem:[#allocation15_spill] sm:$0xff] %v913_v47  ;;  %v103_v49 = vadd.f32 %v913_v47, %v911_v46  ;;  %v923_v52 = vld [vmem:[#allocation2 + $0xf0] sm:$0xff]  ;;  %v925_v53 = vld [vmem:[#allocation2 + $0xf8] sm:$0xff]  ;;  %v164_v61 = vmax.f32 %v891_v36, %v893_v37  ;;  %v167_v63 = vmax.f32 %v911_v46, %v913_v47 }
  0x1a   :  { %68 = vadd.xlane.f32.xlu0 %v67_v17  ;;  %1124 = vst [vmem:[#allocation16_spill] sm:$0xff] %v923_v52  ;;  %1125 = vst [vmem:[#allocation17_spill] sm:$0xff] %v925_v53  ;;  %v106_v54 = vadd.f32 %v925_v53, %v923_v52  ;;  %v170_v62 = vmax.f32 %v923_v52, %v925_v53  ;;  %v384_v7 = vld [vmem:[%s1103_s1 + $0x18] sm:$0xff]  ;;  %v383_v10 = vld [vmem:[%s1103_s1 + $0x10] sm:$0xff] }
  0x1b   :  { %718 = vmatpush3.msra.mxu0 %v384_v7  ;;  %v382_v11 = vld [vmem:[%s1103_s1 + $0x8] sm:$0xff]  ;;  %v381_v16 = vld [vmem:[%s1103_s1] sm:$0xff] }
  0x1c   :  { %719 = vmatprep.subr.mxu0 %v790_v3 }
  0x1d   :  { %89 = vadd.xlane.f32.xlu1 %v88_v22  ;;  %720 = vmatpush3.msra.mxu0 %v383_v10 }
  0x1e   :  { %86 = vadd.xlane.f32.xlu0 %v85_v23  ;;  %721 = vmatprep.subr.mxu0 %v790_v3 }
  0x1f   :  { %722 = vmatpush3.msra.mxu0 %v382_v11 }
  0x20   :  { %723 = vmatprep.subr.mxu0 %v790_v3 }
  0x21   :  { %83 = vadd.xlane.f32.xlu1 %v82_v28  ;;  %724 = vmatpush3.msra.mxu0 %v381_v16 }
  0x22   :  { %71 = vadd.xlane.f32.xlu0 %v70_v29 }
  0x25   :  { %98 = vadd.xlane.f32.xlu1 %v97_v34 }
  0x26   :  { %92 = vadd.xlane.f32.xlu0 %v91_v35 }
  0x29   :  { %126 = vmax.xlane.f32.xlu1 %v125_v38 }
  0x2a   :  { %101 = vadd.xlane.f32.xlu0 %v100_v39 }
  0x2d   :  { %138 = vmax.xlane.f32.xlu1 %v137_v40 }
  0x2e   :  { %129 = vmax.xlane.f32.xlu0 %v128_v41 }
  0x31   :  { %95 = vadd.xlane.f32.xlu1 %v94_v44 }
  0x32   :  { %141 = vmax.xlane.f32.xlu0 %v140_v45 }
  0x35   :  { %132 = vmax.xlane.f32.xlu1 %v131_v48 }
  0x36   :  { %104 = vadd.xlane.f32.xlu0 %v103_v49 }
  0x39   :  { %150 = vmax.xlane.f32.xlu1 %v149_v50 }
  0x3a   :  { %144 = vmax.xlane.f32.xlu0 %v143_v51  ;;  %v189_v51 = vlaneseq }
  0x3d   :  { %107 = vadd.xlane.f32.xlu1 %v106_v54 }
  0x3e   :  { %153 = vmax.xlane.f32.xlu0 %v152_v55 }
  0x41   :  { %147 = vmax.xlane.f32.xlu1 %v146_v56  ;;  %v190_v56 = vand.u32 127, %v189_v51 }
  0x42   :  { %135 = vmax.xlane.f32.xlu0 %v134_v57 }
  0x45   :  { %162 = vmax.xlane.f32.xlu1 %v161_v58 }
  0x46   :  { %156 = vmax.xlane.f32.xlu0 %v155_v59  ;;  %v969_v59 = vshrl.u32 %v189_v51, 7 }
  0x48   :  { %v976_v7 = vsub.s32 %v190_v56, %v969_v59 }
  0x49   :  { %159 = vmax.xlane.f32.xlu1 %v158_v60  ;;  %v195_v60 = vadd.s32 4294967288, %v190_v56 }
  0x4a   :  { %165 = vmax.xlane.f32.xlu0 %v164_v61  ;;  %v202_v61 = vadd.s32 4294967280, %v190_v56 }
  0x4b   :  { %v979_v10 = vsub.s32 %v195_v60, %v969_v59 }
  0x4c   :  { %v982_v52 = vsub.s32 %v202_v61, %v969_v59 }
  0x4d   :  { %171 = vmax.xlane.f32.xlu1 %v170_v62 }
  0x4e   :  { %168 = vmax.xlane.f32.xlu0 %v167_v63  ;;  %v209_v63 = vadd.s32 4294967272, %v190_v56 }
  0x50   :  { %v985_v42 = vsub.s32 %v209_v63, %v969_v59 }
  0x9a   :  { %v75_v17 = vpop.xlane.xlu1 %74 }
  0x9b   :  { %v63_v22 = vpop.xlane.xlu0 %62  ;;  %v113_v11 = vmul.f32 0.00390625, %v75_v17 }
  0x9c   :  { %v109_v43 = vmul.f32 0.00390625, %v63_v22 }
  0x9d   :  { %v219_v17 = vrot.slane %v113_v11, %v976_v7 }
  0x9e   :  { %v78_v23 = vpop.xlane.xlu1 %77 }
  0x9f   :  { %v66_v28 = vpop.xlane.xlu0 %65  ;;  %v114_v16 = vmul.f32 0.00390625, %v78_v23 }
  0xa0   :  { %v110_v53 = vmul.f32 0.00390625, %v66_v28 }
  0xa1   :  { %v223_v23 = vrot.slane %v114_v16, %v979_v10 }
  0xa2   :  { %v81_v29 = vpop.xlane.xlu1 %80  ;;  %v199_v28 = vrot.slane %v110_v53, %v979_v10 }
  0xa3   :  { %v69_v34 = vpop.xlane.xlu0 %68  ;;  %v115_v51 = vmul.f32 0.00390625, %v81_v29  ;;  %v224_v11 = vsel %vm200_vm1, %v223_v23, %v219_v17 }
  0xa4   :  { %v111_v37 = vmul.f32 0.00390625, %v69_v34 }
  0xa5   :  { %v228_v29 = vrot.slane %v115_v51, %v982_v52 }
  0xa6   :  { %v90_v35 = vpop.xlane.xlu1 %89  ;;  %v206_v34 = vrot.slane %v111_v37, %v982_v52 }
  0xa7   :  { %v87_v38 = vpop.xlane.xlu0 %86  ;;  %v118_v36 = vmul.f32 0.00390625, %v90_v35 }
  0xa8   :  { %v117_v47 = vmul.f32 0.00390625, %v87_v38 }
  0xa9   :  { %v242_v22 = vrot.slane %v118_v36, %v979_v10  ;;  %v229_v36 = vsel %vm207_vm2, %v228_v29, %v224_v11 }
  0xaa   :  { %v84_v39 = vpop.xlane.xlu1 %83  ;;  %v238_v35 = vrot.slane %v117_v47, %v976_v7 }
  0xab   :  { %v72_v40 = vpop.xlane.xlu0 %71  ;;  %v116_v56 = vmul.f32 0.00390625, %v84_v39  ;;  %v194_v39 = vrot.slane %v109_v43, %v976_v7 }
  0xac   :  { %v112_v31 = vmul.f32 0.00390625, %v72_v40  ;;  %v243_v51 = vsel %vm200_vm1, %v242_v22, %v238_v35 }
  0xad   :  { %v233_v40 = vrot.slane %v116_v56, %v985_v42  ;;  %v201_v16 = vsel %vm200_vm1, %v199_v28, %v194_v39 }
  0xae   :  { %v99_v41 = vpop.xlane.xlu1 %98  ;;  %v213_v60 = vrot.slane %v112_v31, %v985_v42  ;;  %v208_v47 = vsel %vm207_vm2, %v206_v34, %v201_v16 }
  0xaf   :  { %v93_v44 = vpop.xlane.xlu0 %92  ;;  %v121_v53 = vmul.f32 0.00390625, %v99_v41  ;;  %v234_v56 = vsel %vm214_vm3, %v233_v40, %v229_v36 }
  0xb0   :  { %v119_v61 = vmul.f32 0.00390625, %v93_v44  ;;  %v215_v31 = vsel %vm214_vm3, %v213_v60, %v208_v47 }
  0xb1   :  { %v257_v23 = vrot.slane %v121_v53, %v976_v7 }
  0xb2   :  { %v959_v45 = vpop.xlane.xlu1 %126  ;;  %v247_v44 = vrot.slane %v119_v61, %v982_v52 }
  0xb3   :  { %v102_v48 = vpop.xlane.xlu0 %101 }
  0xb4   :  { %v122_v37 = vmul.f32 0.00390625, %v102_v48  ;;  %v299_v48 = vrot.slane %v959_v45, %v976_v7  ;;  %v248_v60 = vsel %vm207_vm2, %v247_v44, %v243_v51 }
  0xb6   :  { %v961_v49 = vpop.xlane.xlu1 %138  ;;  %v261_v34 = vrot.slane %v122_v37, %v979_v10 }
  0xb7   :  { %v963_v50 = vpop.xlane.xlu0 %129  ;;  %v318_v39 = vrot.slane %v961_v49, %v976_v7 }
  0xb8   :  { %v303_v22 = vrot.slane %v963_v50, %v979_v10  ;;  %v262_v37 = vsel %vm200_vm1, %v261_v34, %v257_v23 }
  0xba   :  { %v96_v54 = vpop.xlane.xlu1 %95 }
  0xbb   :  { %v965_v55 = vpop.xlane.xlu0 %141  ;;  %v120_v41 = vmul.f32 0.00390625, %v96_v54 }
  0xbc   :  { %v322_v28 = vrot.slane %v965_v55, %v979_v10 }
  0xbd   :  { %v252_v50 = vrot.slane %v120_v41, %v985_v42 }
  0xbe   :  { %v967_v57 = vpop.xlane.xlu1 %132  ;;  %v323_v49 = vsel %vm200_vm1, %v322_v28, %v318_v39 }
  0xbf   :  { %v105_v58 = vpop.xlane.xlu0 %104  ;;  %v308_v45 = vrot.slane %v967_v57, %v982_v52 }
  0xc0   :  { %v123_v29 = vmul.f32 0.00390625, %v105_v58 }
  0xc2   :  { %v971_v62 = vpop.xlane.xlu1 %150  ;;  %v266_v53 = vrot.slane %v123_v29, %v982_v52 }
  0xc3   :  { %v973_v3 = vpop.xlane.xlu0 %144  ;;  %v337_v57 = vrot.slane %v971_v62, %v976_v7 }
  0xc4   :  { %v327_v54 = vrot.slane %v973_v3, %v982_v52  ;;  %v267_v23 = vsel %vm207_vm2, %v266_v53, %v262_v37  ;;  %v589_v37 = vsub.s32 2, %v969_v59 }
  0xc6   :  { %v108_v46 = vpop.xlane.xlu1 %107  ;;  %v328_v11 = vsel %vm207_vm2, %v327_v54, %v323_v49 }
  0xc7   :  { %v987_v30 = vpop.xlane.xlu0 %153  ;;  %v124_v35 = vmul.f32 0.00390625, %v108_v46 }
  0xc8   :  { %v341_v55 = vrot.slane %v987_v30, %v979_v10 }
  0xc9   :  { %v271_v16 = vrot.slane %v124_v35, %v985_v42 }
  0xca   :  { %v148_v38 = vpop.xlane.xlu1 %147  ;;  %v342_v47 = vsel %vm200_vm1, %v341_v55, %v337_v57 }
  0xcb   :  { %v136_v63 = vpop.xlane.xlu0 %135  ;;  %v332_v58 = vrot.slane %v148_v38, %v985_v42  ;;  %v304_v38 = vsel %vm200_vm1, %v303_v22, %v299_v48  ;;  %v272_v22 = vsel %vm214_vm3, %v271_v16, %v267_v23  ;;  %v570_v16 = vsub.s32 1, %v969_v59 }
  0xcc   :  { %v313_v61 = vrot.slane %v136_v63, %v985_v42  ;;  %v309_v36 = vsel %vm207_vm2, %v308_v45, %v304_v38 }
  0xcd   :  { %v333_v51 = vsel %vm214_vm3, %v332_v58, %v328_v11 }
  0xce   :  { %v163_v43 = vpop.xlane.xlu1 %162  ;;  %v314_v62 = vsel %vm214_vm3, %v313_v61, %v309_v36 }
  0xcf   :  { %v157_v17 = vpop.xlane.xlu0 %156  ;;  %v356_v41 = vrot.slane %v163_v43, %v976_v7  ;;  %v274_v7 = vsel %vm273_vm4, %v234_v56, %v215_v31  ;;  %v373_v43 = vsel %vm372_vm5, %v333_v51, %v314_v62  ;;  %v385_v56 = vld [vmem:[%s1104_s2] sm:$0x3]  ;;  %s792_s2 = smov [#allocation5]  }
  0xd0   :  { %v346_v46 = vrot.slane %v157_v17, %v982_v52  ;;  %729 = vmatpush3.msk.msra.mxu1 %vm465_vm12, %v385_v56  ;;  %v1129_v56 = vld [vmem:[#allocation13_spill] sm:$0xff]  ;;  %s694_s27 = sshll.u32 %s792_s2, 4  ;;  %s695_s27 = int_to_ptr.vmem [resolvable:$true] %s694_s27 }
  0xd1   :  { %s763_s28 = scalar_lea.vmem %s695_s27, 4096  ;;  %p768_p6 = scmp.lt.s32.totalorder %s695_s27, %s695_s27 }
  0xd2   :  { %v160_v40 = vpop.xlane.xlu1 %159  ;;  %v347_v17 = vsel %vm207_vm2, %v346_v46, %v342_v47  ;;  %v608_v47 = vsub.s32 3, %v969_v59  ;;  %p764_p5 = scmp.ne.s32.totalorder %s695_s27, %s763_s28  ;;  %p769_p7 = scmp.lt.s32.totalorder %s763_s28, %s763_s28 }
  0xd3   :  { %v166_v3 = vpop.xlane.xlu0 %165  ;;  %v351_v30 = vrot.slane %v160_v40, %v985_v42 }
  0xd4   :  { %v360_v63 = vrot.slane %v166_v3, %v979_v10  ;;  %v253_v10 = vsel %vm214_vm3, %v252_v50, %v248_v60  ;;  %p770_p8 = por %p769_p7, %p768_p6 }
  0xd5   :  { %v352_v29 = vsel %vm214_vm3, %v351_v30, %v347_v17  ;;  %v276_v45 = vsel %vm275_vm7, %v253_v10, %v274_v7  ;;  %v551_v30 = vsub.s32 0, %v969_v59 }
  0xd6   :  { %v172_v44 = vpop.xlane.xlu1 %171  ;;  %v361_v54 = vsel %vm200_vm1, %v360_v63, %v356_v41  ;;  %v375_v35 = vsel %vm374_vm6, %v352_v29, %v373_v43  ;;  %p771_p9 = pnand %p770_p8, %p764_p5 }
  0xd7   :  { %v169_v48 = vpop.xlane.xlu0 %168  ;;  %v370_v28 = vrot.slane %v172_v44, %v985_v42 }
  0xd8   :  { %v365_v34 = vrot.slane %v169_v48, %v982_v52  ;;  %v278_v52 = vsel %vm277_vm8, %v272_v22, %v276_v45  ;;  %v1126_v45 = vld [vmem:[#allocation8_spill] sm:$0xff] }
  0xda   :  { %v366_v42 = vsel %vm207_vm2, %v365_v34, %v361_v54 }
  0xdb   :  { %v371_v39 = vsel %vm214_vm3, %v370_v28, %v366_v42 }
  0xdc   :  { %v377_v55 = vsel %vm376_vm9, %v371_v39, %v375_v35 }
  0xdd   :  { %v380_v58 = vsel %vm379_vm10, %v278_v52, %v377_v55  ;;  %v1127_v55 = vld [vmem:[#allocation9_spill] sm:$0xff] }
  0xde   :  { %726 = vmatmul.mubr.msk.f32.vlgmr.msra.gmra.mxu0 %vm386_vm11, %v380_v58 }
 0x19e   :  { %v456_v31 = vpop.f32.mrf.mxu0 }
 0x19f   :  { %v460_v40 = vmax.f32 %v456_v31, 0.0 }
 0x1a0   :  { %v727_v60 = vpop.f32.mrf.mxu0 }
 0x1a1   :  { %731 = vmatmul.mubr.msk.f32.vlgmr.msra.gmra.mxu1 %vm461_vm13, %v460_v40  ;;  %v1130_v40 = vld [vmem:[#allocation14_spill] sm:$0xff] }
 0x261   :  { %v535_v50 = vpop.f32.mrf.mxu1 }
 0x262   :  { %v540_v61 = vrot.slane %v535_v50, 4 }
 0x263   :  { %v732_v46 = vpop.f32.mrf.mxu1 }
 0x264   :  { %v542_v3 = vadd.f32 %v540_v61, %v535_v50  ;;  %v1131_v50 = vld [vmem:[#allocation15_spill] sm:$0xff]  ;;  %v1132_v61 = vld [vmem:[#allocation10_spill] sm:$0xff] }
 0x266   :  { %v709_v49 = vmul.f32 -1.442695, %v542_v3  ;;  %v1133_v3 = vld [vmem:[#allocation11_spill] sm:$0xff] }
 0x268   :  { %739 = vpow2.f32 %v709_v49 }
 0x275   :  { %v740_v53 = vpop.eup %739 }
 0x276   :  { %v546_v57 = vadd.f32 1.0, %v740_v53 }
 0x278   :  { %741 = vrcp.f32 %v546_v57  ;;  %v1134_v57 = vld [vmem:[#allocation16_spill] sm:$0xff] }
 0x285   :  { %v742_v38 = vpop.eup %741 }
 0x286   :  { %v552_v11 = vrot.slane %v742_v38, %v551_v30  ;;  %v571_v63 = vrot.slane %v742_v38, %v570_v16  ;;  %v590_v36 = vrot.slane %v742_v38, %v589_v37  ;;  %v609_v51 = vrot.slane %v742_v38, %v608_v47  ;;  %v1135_v38 = vld [vmem:[#allocation17_spill] sm:$0xff] }
 0x288   :  { %558 = vbcast.lane.b32.xlu1 %v552_v11, 264  ;;  %554 = vbcast.lane.b32.xlu0 %v552_v11, 256 }
 0x28c   :  { %562 = vbcast.lane.b32.xlu1 %v552_v11, 272  ;;  %573 = vbcast.lane.b32.xlu0 %v571_v63, 256 }
 0x290   :  { %566 = vbcast.lane.b32.xlu1 %v552_v11, 280  ;;  %581 = vbcast.lane.b32.xlu0 %v571_v63, 272 }
 0x294   :  { %577 = vbcast.lane.b32.xlu1 %v571_v63, 264  ;;  %592 = vbcast.lane.b32.xlu0 %v590_v36, 256 }
 0x298   :  { %585 = vbcast.lane.b32.xlu1 %v571_v63, 280  ;;  %600 = vbcast.lane.b32.xlu0 %v590_v36, 272 }
 0x29c   :  { %596 = vbcast.lane.b32.xlu1 %v590_v36, 264  ;;  %611 = vbcast.lane.b32.xlu0 %v609_v51, 256 }
 0x2a0   :  { %604 = vbcast.lane.b32.xlu1 %v590_v36, 280  ;;  %619 = vbcast.lane.b32.xlu0 %v609_v51, 272 }
 0x2a4   :  { %615 = vbcast.lane.b32.xlu1 %v609_v51, 264 }
 0x2a8   :  { %623 = vbcast.lane.b32.xlu1 %v609_v51, 280 }
 0x2fa   :  { %v559_v44 = vpop.permute.xlu1 %558  ;;  %v555_v62 = vpop.permute.xlu0 %554 }
 0x2fb   :  { %v627_v41 = vmul.f32 %v559_v44, %v835_v8  ;;  %v628_v17 = vmul.f32 %v559_v44, %v837_v9  ;;  %v625_v48 = vmul.f32 %v555_v62, %v823_v2  ;;  %v626_v28 = vmul.f32 %v555_v62, %v827_v4 }
 0x2fd   :  { %659 = vst [vmem:[#allocation5 + $0x10] sm:$0xff] %v627_v41  ;;  %660 = vst [vmem:[#allocation5 + $0x18] sm:$0xff] %v628_v17 }
 0x2fe   :  { %657 = vst [vmem:[#allocation5] sm:$0xff] %v625_v48  ;;  %658 = vst [vmem:[#allocation5 + $0x8] sm:$0xff] %v626_v28  ;;  %v563_v59 = vpop.permute.xlu1 %562  ;;  %v574_v10 = vpop.permute.xlu0 %573 }
 0x2ff   :  { %v629_v23 = vmul.f32 %v563_v59, %v847_v14  ;;  %v630_v29 = vmul.f32 %v563_v59, %v849_v15  ;;  %v633_v34 = vmul.f32 %v574_v10, %v819_v0  ;;  %v634_v8 = vmul.f32 %v574_v10, %v821_v1 }
 0x301   :  { %661 = vst [vmem:[#allocation5 + $0x20] sm:$0xff] %v629_v23  ;;  %662 = vst [vmem:[#allocation5 + $0x28] sm:$0xff] %v630_v29 }
 0x302   :  { %665 = vst [vmem:[#allocation5 + $0x40] sm:$0xff] %v633_v34  ;;  %666 = vst [vmem:[#allocation5 + $0x48] sm:$0xff] %v634_v8  ;;  %v567_v2 = vpop.permute.xlu1 %566  ;;  %v582_v4 = vpop.permute.xlu0 %581 }
 0x303   :  { %v631_v9 = vmul.f32 %v567_v2, %v871_v26  ;;  %v632_v22 = vmul.f32 %v567_v2, %v873_v27  ;;  %v637_v54 = vmul.f32 %v582_v4, %v843_v12  ;;  %v638_v14 = vmul.f32 %v582_v4, %v845_v13 }
 0x305   :  { %663 = vst [vmem:[#allocation5 + $0x30] sm:$0xff] %v631_v9  ;;  %664 = vst [vmem:[#allocation5 + $0x38] sm:$0xff] %v632_v22 }
 0x306   :  { %669 = vst [vmem:[#allocation5 + $0x60] sm:$0xff] %v637_v54  ;;  %670 = vst [vmem:[#allocation5 + $0x68] sm:$0xff] %v638_v14  ;;  %v578_v0 = vpop.permute.xlu1 %577  ;;  %v593_v1 = vpop.permute.xlu0 %592 }
 0x307   :  { %v635_v15 = vmul.f32 %v578_v0, %v829_v5  ;;  %v636_v7 = vmul.f32 %v578_v0, %v831_v6  ;;  %v641_v43 = vmul.f32 %v593_v1, %v859_v20  ;;  %v642_v26 = vmul.f32 %v593_v1, %v861_v21 }
 0x309   :  { %667 = vst [vmem:[#allocation5 + $0x50] sm:$0xff] %v635_v15  ;;  %668 = vst [vmem:[#allocation5 + $0x58] sm:$0xff] %v636_v7 }
 0x30a   :  { %673 = vst [vmem:[#allocation5 + $0x80] sm:$0xff] %v641_v43  ;;  %674 = vst [vmem:[#allocation5 + $0x88] sm:$0xff] %v642_v26  ;;  %v586_v12 = vpop.permute.xlu1 %585  ;;  %v601_v13 = vpop.permute.xlu0 %600 }
 0x30b   :  { %v639_v27 = vmul.f32 %v586_v12, %v867_v24  ;;  %v640_v42 = vmul.f32 %v586_v12, %v869_v25  ;;  %v645_v35 = vmul.f32 %v601_v13, %v883_v32  ;;  %v646_v5 = vmul.f32 %v601_v13, %v885_v33  ;;  %v1128_v33 = vld [vmem:[#allocation12_spill] sm:$0xff] }
 0x30d   :  { %671 = vst [vmem:[#allocation5 + $0x70] sm:$0xff] %v639_v27  ;;  %672 = vst [vmem:[#allocation5 + $0x78] sm:$0xff] %v640_v42 }
 0x30e   :  { %677 = vst [vmem:[#allocation5 + $0xa0] sm:$0xff] %v645_v35  ;;  %678 = vst [vmem:[#allocation5 + $0xa8] sm:$0xff] %v646_v5  ;;  %v597_v6 = vpop.permute.xlu1 %596  ;;  %v612_v20 = vpop.permute.xlu0 %611 }
 0x30f   :  { %v643_v21 = vmul.f32 %v597_v6, %v855_v18  ;;  %v644_v39 = vmul.f32 %v597_v6, %v857_v19  ;;  %v649_v52 = vmul.f32 %v612_v20, %v1126_v45  ;;  %v650_v24 = vmul.f32 %v612_v20, %v1127_v55 }
 0x311   :  { %675 = vst [vmem:[#allocation5 + $0x90] sm:$0xff] %v643_v21  ;;  %676 = vst [vmem:[#allocation5 + $0x98] sm:$0xff] %v644_v39 }
 0x312   :  { %681 = vst [vmem:[#allocation5 + $0xc0] sm:$0xff] %v649_v52  ;;  %682 = vst [vmem:[#allocation5 + $0xc8] sm:$0xff] %v650_v24  ;;  %v605_v25 = vpop.permute.xlu1 %604  ;;  %v620_v32 = vpop.permute.xlu0 %619 }
 0x313   :  { %v647_v58 = vmul.f32 %v605_v25, %v1128_v33  ;;  %v648_v31 = vmul.f32 %v605_v25, %v1129_v56  ;;  %v653_v60 = vmul.f32 %v620_v32, %v1130_v40  ;;  %v654_v18 = vmul.f32 %v620_v32, %v1131_v50 }
 0x315   :  { %679 = vst [vmem:[#allocation5 + $0xb0] sm:$0xff] %v647_v58  ;;  %680 = vst [vmem:[#allocation5 + $0xb8] sm:$0xff] %v648_v31 }
 0x316   :  { %685 = vst [vmem:[#allocation5 + $0xe0] sm:$0xff] %v653_v60  ;;  %686 = vst [vmem:[#allocation5 + $0xe8] sm:$0xff] %v654_v18  ;;  %v616_v19 = vpop.permute.xlu1 %615 }
 0x317   :  { %v651_v46 = vmul.f32 %v616_v19, %v1132_v61  ;;  %v652_v49 = vmul.f32 %v616_v19, %v1133_v3 }
 0x319   :  { %683 = vst [vmem:[#allocation5 + $0xd0] sm:$0xff] %v651_v46  ;;  %684 = vst [vmem:[#allocation5 + $0xd8] sm:$0xff] %v652_v49 }
 0x31a   :  { %v624_v53 = vpop.permute.xlu1 %623 }
 0x31b   :  { %v655_v30 = vmul.f32 %v624_v53, %v1134_v57  ;;  %v656_v11 = vmul.f32 %v624_v53, %v1135_v38 }
 0x31d   :  { %687 = vst [vmem:[#allocation5 + $0xf0] sm:$0xff] %v655_v30  ;;  %688 = vst [vmem:[#allocation5 + $0xf8] sm:$0xff] %v656_v11 }
 0x31e   :  { %774 = shalt.err (!%p771_p9)
}
 0x31f   :  { %700 = dma.vmem_to_hbm [thread:$0]  %s695_s27, 4096, %s1105_s3, [#allocation4], %s788_s15, %s788_s15, %s789_s16  }
 0x320   :  { %785 = dma.done.wait [#allocation4], 4096  }
 0x321   :  { %786 = vsyncadd [#allocation4], 4294963200 }
 0x322   :  { %704 = vsyncpa [#allocation3], 1 }
 0x323   :  { %705 = vsyncpa [#allocation4], 1 }

</bundles_post_ra>
